<compile_context>
chip_gen: v6e
topology: v6e:2x2x1
jax: 0.10.0
libtpu: 0.0.40
codegen_flags: <defaults>
</compile_context>

<pallas_src>
import functools

import jax
import jax.numpy as jnp
from jax import lax
from jax.experimental import pallas as pl
from jax.experimental.pallas import tpu as pltpu


# ----------------------------------------------------------------------------
# Kernels
# ----------------------------------------------------------------------------
def _unweighted_kernel(pred_ref, targ_ref, sse_ref):
    """Accumulate sum((pred-targ)^2) into a per-shard (1, H, W) slab."""
    i = pl.program_id(1)

    @pl.when(i == 0)
    def _():
        sse_ref[...] = jnp.zeros_like(sse_ref)

    diff = pred_ref[...].astype(jnp.float32) - targ_ref[...].astype(jnp.float32)
    sq = diff * diff                      # (TB, C, H, W)
    partial = jnp.sum(sq, axis=1)         # (TB, H, W)  - elementwise adds over C
    partial = jnp.sum(partial, axis=0)    # (H, W)      - elementwise adds over TB
    sse_ref[...] += partial[None, :, :]


def _weighted_kernel(pred_ref, targ_ref, num_ref, den_ref, force_ref, *,
                     h, w, n1, n2, right_start):
    """Accumulate masked sum((pred-targ)^2) and sum(mask) per shard.

    mask[b, y, x] = 0 if sum_c targ[b, c, y, x] < -2.999 else 1, then forced
    to 1 where (y < n1) | (x < n2) | (x >= right_start).
    """
    i = pl.program_id(1)

    @pl.when(i == 0)
    def _():
        num_ref[...] = jnp.zeros_like(num_ref)
        den_ref[...] = jnp.zeros_like(den_ref)
        # Static force mask: depends only on (h, w, n1, n2) -> hoisted, built
        # once per shard instead of per grid step.
        row = lax.broadcasted_iota(jnp.int32, (h, w), 0)
        col = lax.broadcasted_iota(jnp.int32, (h, w), 1)
        force = (row < n1) | (col < n2) | (col >= right_start)
        force_ref[...] = force.astype(jnp.float32)

    pred = pred_ref[...].astype(jnp.float32)   # (TB, C, H, W)
    targ = targ_ref[...].astype(jnp.float32)

    diff = pred - targ
    sq_c = jnp.sum(diff * diff, axis=1)        # (TB, H, W)  channel-first reduce
    ch_sum = jnp.sum(targ, axis=1)             # (TB, H, W)

    # mask: forced pixels -> 1; otherwise 0 where channel-sum < -2.999 else 1.
    mask = jnp.where(ch_sum < -2.999, force_ref[...][None, :, :], 1.0)

    num_ref[...] += jnp.sum(mask * sq_c, axis=0)[None, :, :]   # (1, H, W)
    den_ref[...] += jnp.sum(mask, axis=0)[None, :, :]          # (1, H, W)


# ----------------------------------------------------------------------------
# Module wrapper
# ----------------------------------------------------------------------------
class ReconstructionLoss:
    def __init__(self, l=256):
        # NOTE: the PyTorch __init__ creates a local `outside_mask` that is
        # never used or registered; no learnable parameters exist.
        self.l = l
        self.n1 = int(80.0 / 256.0 * l)
        self.n2 = int(40.0 / 256.0 * l)

    @staticmethod
    def _pick_tb(batch, per_sample_bytes, target_bytes=4 << 20, cap=8):
        """Largest divisor of `batch` whose block stays near `target_bytes`."""
        tb_target = max(1, min(cap, target_bytes // max(per_sample_bytes, 1)))
        tb = 1
        for d in range(1, batch + 1):
            if batch % d == 0 and d <= tb_target:
                tb = d
        return tb

    def __call__(self, pred, targ, weights=None):
        assert pred.shape == targ.shape
        B, C, H, W = pred.shape

        per_sample_bytes = C * H * W * jnp.dtype(pred.dtype).itemsize
        TB = self._pick_tb(B, per_sample_bytes)
        G = B // TB                                   # total accumulation steps
        NS = 2 if (G >= 2 and G % 2 == 0) else 1      # megacore shards (v7x)
        S = G // NS                                   # inner steps per shard

        in_block = pl.BlockSpec((TB, C, H, W), lambda s, i: (s * S + i, 0, 0, 0))
        out_block = pl.BlockSpec((1, H, W), lambda s, i: (s, 0, 0))
        cparams = pltpu.CompilerParams(
            dimension_semantics=("parallel", "arbitrary"),
            vmem_limit_bytes=32 * 1024 * 1024,   # safe on v5e/v6e/v7x; TB cap keeps
                                                 # double-buffered blocks well inside it
        )

        if weights is None:
            sse = pl.pallas_call(
                _unweighted_kernel,
                out_shape=jax.ShapeDtypeStruct((NS, H, W), jnp.float32),
                grid=(NS, S),
                in_specs=[in_block, in_block],
                out_specs=out_block,
                compiler_params=cparams,
            )(pred, targ)
            # equal-sized samples: mean of per-sample means == global mean
            return 0.5 * jnp.sum(sse) / float(B * C * H * W)
        else:
            # `weights` only selects the branch in the reference module; its
            # values are never read there either.
            right_start = (W - self.n2) if self.n2 > 0 else 0
            kern = functools.partial(
                _weighted_kernel,
                h=H, w=W, n1=self.n1, n2=self.n2, right_start=right_start,
            )
            num, den = pl.pallas_call(
                kern,
                out_shape=(
                    jax.ShapeDtypeStruct((NS, H, W), jnp.float32),
                    jax.ShapeDtypeStruct((NS, H, W), jnp.float32),
                ),
                grid=(NS, S),
                in_specs=[in_block, in_block],
                out_specs=(out_block, out_block),
                scratch_shapes=[pltpu.VMEM((H, W), jnp.float32)],
                compiler_params=cparams,
            )(pred, targ)
            return 0.5 * jnp.sum(num) / jnp.sum(den)


# ----------------------------------------------------------------------------
# Pure-JAX references (for correctness checking only)
# ----------------------------------------------------------------------------
def _ref_unweighted(pred, targ):
    bs = pred.shape[0]
    sq = jnp.square(pred - targ).reshape(bs, -1)
    return jnp.mean(0.5 * jnp.mean(sq, axis=1))


def _ref_weighted(pred, targ, n1, n2):
    ch_sum = jnp.sum(targ, axis=1, keepdims=True)                 # (B,1,H,W)
    masks = jnp.where(ch_sum < -2.999, 0.0, 1.0).astype(jnp.float32)
    masks = masks.at[:, :, :n1, :].set(1.0)
    masks = masks.at[:, :, :, :n2].set(1.0)
    if n2 > 0:
        masks = masks.at[:, :, :, -n2:].set(1.0)
    else:                                                          # PyTorch [-0:] == full
        masks = jnp.ones_like(masks)
    return 0.5 * jnp.sum(jnp.square(pred - targ) * masks) / jnp.sum(masks)


# ----------------------------------------------------------------------------
if __name__ == "__main__":
    l = 16          # small spatial size (PyTorch default is 256)
    B, C = 2, 3     # module implies 3 channels (outside_mask = zeros([3, l, l]))

    key = jax.random.PRNGKey(0)
    k1, k2 = jax.random.split(key)
    pred = jax.random.normal(k1, (B, C, l, l), dtype=jnp.float32)
    # targ near -1 per channel so that some pixels have channel-sum < -2.999
    targ = jax.random.normal(k2, (B, C, l, l), dtype=jnp.float32) * 0.5 - 1.0

    loss_fn = ReconstructionLoss(l=l)

    # Branch 1: weights is None
    out_unw = jax.block_until_ready(loss_fn(pred, targ))
    ref_unw = _ref_unweighted(pred, targ)
    assert jnp.allclose(out_unw, ref_unw, rtol=1e-5, atol=1e-6), (out_unw, ref_unw)

    # Branch 2: weights provided (values unused, only toggles the masked branch)
    dummy_weights = jnp.ones((B,), dtype=jnp.float32)
    out_w = jax.block_until_ready(loss_fn(pred, targ, weights=dummy_weights))
    ref_w = _ref_weighted(pred, targ, loss_fn.n1, loss_fn.n2)
    assert jnp.allclose(out_w, ref_w, rtol=1e-5, atol=1e-6), (out_w, ref_w)

    print("KERNEL_OK")
</pallas_src>

<mosaic_0001>
module attributes {stable_mosaic.version = 11 : i64} {
  func.func @_unweighted_kernel(%arg0: i32, %arg1: i32, %arg2: memref<2x3x16x16xf32, #tpu.memory_space<vmem>>, %arg3: memref<2x3x16x16xf32, #tpu.memory_space<vmem>>, %arg4: memref<1x16x16xf32, #tpu.memory_space<vmem>>) attributes {dimension_semantics = [#tpu.dimension_semantics<parallel>, #tpu.dimension_semantics<arbitrary>], iteration_bounds = array<i64: 1, 1>, scalar_prefetch = 0 : i64, scratch_operands = 0 : i64, tpu.core_type = #tpu.core_type<tc>, window_params = [{transform_indices = @transform_0, window_bounds = array<i64: 2, 3, 16, 16>}, {transform_indices = @transform_1, window_bounds = array<i64: 2, 3, 16, 16>}, {transform_indices = @transform_2, window_bounds = array<i64: 1, 16, 16>}]} {
    %c0_i32 = arith.constant 0 : i32
    %0 = arith.cmpi eq, %arg1, %c0_i32 : i32
    %1 = arith.extui %0 : i1 to i32
    %c0_i32_0 = arith.constant 0 : i32
    %2 = arith.cmpi ne, %1, %c0_i32_0 : i32
    scf.if %2 {
      %cst_15 = arith.constant 0.000000e+00 : f32
      %13 = vector.broadcast %cst_15 : f32 to vector<1x16x16xf32>
      %c0_16 = arith.constant 0 : index
      %c0_17 = arith.constant 0 : index
      %c0_18 = arith.constant 0 : index
      %14 = vector.load %arg4[%c0_16, %c0_17, %c0_18] : memref<1x16x16xf32, #tpu.memory_space<vmem>>, vector<1x16x16xf32>
      tpu.vector_store %arg4[%c0_16, %c0_17, %c0_18], %13 {strides = array<i32>} : memref<1x16x16xf32, #tpu.memory_space<vmem>>, vector<1x16x16xf32>,
    } else {
    }
    %c0 = arith.constant 0 : index
    %c0_1 = arith.constant 0 : index
    %c0_2 = arith.constant 0 : index
    %c0_3 = arith.constant 0 : index
    %3 = vector.load %arg2[%c0, %c0_1, %c0_2, %c0_3] : memref<2x3x16x16xf32, #tpu.memory_space<vmem>>, vector<2x3x16x16xf32>
    %c0_4 = arith.constant 0 : index
    %c0_5 = arith.constant 0 : index
    %c0_6 = arith.constant 0 : index
    %c0_7 = arith.constant 0 : index
    %4 = vector.load %arg3[%c0_4, %c0_5, %c0_6, %c0_7] : memref<2x3x16x16xf32, #tpu.memory_space<vmem>>, vector<2x3x16x16xf32>
    %5 = arith.subf %3, %4 : vector<2x3x16x16xf32>
    %6 = arith.mulf %5, %5 : vector<2x3x16x16xf32>
    %cst = arith.constant dense<0.000000e+00> : vector<2x16x16xf32>
    %7 = vector.multi_reduction <add>, %6, %cst [1] : vector<2x3x16x16xf32> to vector<2x16x16xf32>
    %cst_8 = arith.constant dense<0.000000e+00> : vector<16x16xf32>
    %8 = vector.multi_reduction <add>, %7, %cst_8 [0] : vector<2x16x16xf32> to vector<16x16xf32>
    %c0_9 = arith.constant 0 : index
    %c0_10 = arith.constant 0 : index
    %c0_11 = arith.constant 0 : index
    %9 = vector.load %arg4[%c0_9, %c0_10, %c0_11] : memref<1x16x16xf32, #tpu.memory_space<vmem>>, vector<1x16x16xf32>
    %10 = vector.shape_cast %8 : vector<16x16xf32> to vector<1x16x16xf32>
    %11 = arith.addf %9, %10 : vector<1x16x16xf32>
    %c0_12 = arith.constant 0 : index
    %c0_13 = arith.constant 0 : index
    %c0_14 = arith.constant 0 : index
    %12 = vector.load %arg4[%c0_12, %c0_13, %c0_14] : memref<1x16x16xf32, #tpu.memory_space<vmem>>, vector<1x16x16xf32>
    tpu.vector_store %arg4[%c0_12, %c0_13, %c0_14], %11 {strides = array<i32>} : memref<1x16x16xf32, #tpu.memory_space<vmem>>, vector<1x16x16xf32>,
    return
  }
  func.func @transform_0(%arg0: i32, %arg1: i32) -> (i32, i32, i32, i32) {
    %c1_i32 = arith.constant 1 : i32
    %0 = arith.muli %arg0, %c1_i32 : i32
    %1 = arith.addi %0, %arg1 : i32
    %c0_i32 = arith.constant 0 : i32
    %c0_i32_0 = arith.constant 0 : i32
    %c0_i32_1 = arith.constant 0 : i32
    %c0_i32_2 = arith.constant 0 : i32
    return %1, %c0_i32, %c0_i32_0, %c0_i32_1 : i32, i32, i32, i32
  }
  func.func @transform_1(%arg0: i32, %arg1: i32) -> (i32, i32, i32, i32) {
    %c1_i32 = arith.constant 1 : i32
    %0 = arith.muli %arg0, %c1_i32 : i32
    %1 = arith.addi %0, %arg1 : i32
    %c0_i32 = arith.constant 0 : i32
    %c0_i32_0 = arith.constant 0 : i32
    %c0_i32_1 = arith.constant 0 : i32
    %c0_i32_2 = arith.constant 0 : i32
    return %1, %c0_i32, %c0_i32_0, %c0_i32_1 : i32, i32, i32, i32
  }
  func.func @transform_2(%arg0: i32, %arg1: i32) -> (i32, i32, i32) {
    %c0_i32 = arith.constant 0 : i32
    %c0_i32_0 = arith.constant 0 : i32
    %c0_i32_1 = arith.constant 0 : i32
    return %arg0, %c0_i32, %c0_i32_0 : i32, i32, i32
  }
}

</mosaic_0001>

<bundles_post_ra>
// kernel: tpu_custom_call.1
= control target key start
LH: loop header
LB: loop body
LE: loop exit
PB: predicated region body
PF: predicated region fallthrough
CT: control target
= control target key end

     0   :  { %7 = vsyncpa [#allocation3], 0  ;;  %s291_s0 = inlined_call_operand.hbm [shape: f32[2,3,16,16], index: 0, kind: input, shape index: {}]   ;;  %s292_s1 = inlined_call_operand.hbm [shape: f32[2,3,16,16], index: 1, kind: input, shape index: {}]   ;;  %s293_s2 = inlined_call_operand.hbm [shape: f32[1,16,16], index: 2, kind: output, shape index: {}]  }
   0x1   :  { %8 = vsyncpa [#allocation6], 0 }
   0x2   :  { %9 = vsyncpa [#allocation4], 0  ;;  %s232_s9 = smov [#allocation2]  }
   0x3   :  { %s20_s10 = sshll.u32 %s232_s9, 4  ;;  %s21_s10 = int_to_ptr.vmem [resolvable:$true] %s20_s10 }
   0x4   :  { %s174_s11 = scalar_lea.vmem %s21_s10, 1536  ;;  %p179_p1 = scmp.lt.s32.totalorder %s21_s10, %s21_s10 }
   0x5   :  { %p175_p0 = scmp.ne.s32.totalorder %s21_s10, %s174_s11  ;;  %p180_p2 = scmp.lt.s32.totalorder %s174_s11, %s174_s11 }
   0x7   :  { %p181_p3 = por %p180_p2, %p179_p1 }
   0x9   :  { %p182_p4 = pnand %p181_p3, %p175_p0 }
   0xb   :  { %185 = shalt.err (!%p182_p4)
}
   0xc   :  { %s233_s12 = smov 128   ;;  %s234_s13 = smov 8  }
   0xd   :  { %26 = dma.hbm_to_vmem [thread:$0]  %s291_s0, 1536, %s21_s10, [#allocation3], %s233_s12, %s233_s12, %s234_s13  }
   0xe   :  { %s235_s16 = smov [#allocation5]  }
   0xf   :  { %s37_s17 = sshll.u32 %s235_s16, 4  ;;  %s38_s17 = int_to_ptr.vmem [resolvable:$true] %s37_s17 }
  0x10   :  { %s194_s18 = scalar_lea.vmem %s38_s17, 1536  ;;  %p199_p6 = scmp.lt.s32.totalorder %s38_s17, %s38_s17 }
  0x11   :  { %p195_p5 = scmp.ne.s32.totalorder %s38_s17, %s194_s18  ;;  %p200_p7 = scmp.lt.s32.totalorder %s194_s18, %s194_s18 }
  0x13   :  { %p201_p8 = por %p200_p7, %p199_p6 }
  0x15   :  { %p202_p9 = pnand %p201_p8, %p195_p5 }
  0x17   :  { %205 = shalt.err (!%p202_p9)
}
  0x18   :  { %43 = dma.hbm_to_vmem [thread:$0]  %s292_s1, 1536, %s38_s17, [#allocation6], %s233_s12, %s233_s12, %s234_s13  }
  0x19   :  { %226 = dma.done.wait [#allocation3], 1536  }
  0x1a   :  { %227 = vsyncadd [#allocation3], 4294965760 }
  0x1b   :  { %228 = dma.done.wait [#allocation6], 1536  }
  0x1c   :  { %229 = vsyncadd [#allocation6], 4294965760  ;;  %vm58_vm0 = vcmask 130048   ;;  %v236_v0 = vmov 0.0   ;;  %v61_v1 = vld [vmem:[#allocation2] sm:$0xff]  ;;  %v63_v2 = vld [vmem:[#allocation2 + $0x10] sm:$0xff] }
  0x1d   :  { %59 = vst.msk [vmem:[#allocation7] sm:$0xff] %vm58_vm0, %v236_v0  ;;  %60 = vst.msk [vmem:[#allocation7 + $0x8] sm:$0xff] %vm58_vm0, %v236_v0  ;;  %v65_v3 = vld [vmem:[#allocation2 + $0x20] sm:$0xff]  ;;  %v67_v4 = vld [vmem:[#allocation2 + $0x30] sm:$0xff]  ;;  %s237_s0 = smov [#allocation7]  }
  0x1e   :  { %v69_v5 = vld [vmem:[#allocation2 + $0x40] sm:$0xff]  ;;  %v71_v6 = vld [vmem:[#allocation2 + $0x50] sm:$0xff]  ;;  %v62_v19 = vld [vmem:[#allocation2 + $0x8] sm:$0xff]  ;;  %s147_s1 = sshll.u32 %s237_s0, 4  ;;  %s148_s1 = int_to_ptr.vmem [resolvable:$true] %s147_s1 }
  0x1f   :  { %v73_v7 = vld [vmem:[#allocation5] sm:$0xff]  ;;  %v75_v8 = vld [vmem:[#allocation5 + $0x10] sm:$0xff]  ;;  %v64_v20 = vld [vmem:[#allocation2 + $0x18] sm:$0xff]  ;;  %s206_s21 = scalar_lea.vmem %s148_s1, 256  ;;  %p211_p11 = scmp.lt.s32.totalorder %s148_s1, %s148_s1 }
  0x20   :  { %v77_v9 = vld [vmem:[#allocation5 + $0x20] sm:$0xff]  ;;  %v79_v10 = vld [vmem:[#allocation5 + $0x30] sm:$0xff]  ;;  %v85_v13 = vsub.f32 %v61_v1, %v73_v7  ;;  %v87_v14 = vsub.f32 %v63_v2, %v75_v8  ;;  %v66_v24 = vld [vmem:[#allocation2 + $0x28] sm:$0xff]  ;;  %p207_p10 = scmp.ne.s32.totalorder %s148_s1, %s206_s21  ;;  %p212_p12 = scmp.lt.s32.totalorder %s206_s21, %s206_s21 }
  0x21   :  { %v81_v11 = vld [vmem:[#allocation5 + $0x40] sm:$0xff]  ;;  %v83_v12 = vld [vmem:[#allocation5 + $0x50] sm:$0xff]  ;;  %v89_v15 = vsub.f32 %v65_v3, %v77_v9  ;;  %v91_v16 = vsub.f32 %v67_v4, %v79_v10  ;;  %v68_v25 = vld [vmem:[#allocation2 + $0x38] sm:$0xff] }
  0x22   :  { %v93_v17 = vsub.f32 %v69_v5, %v81_v11  ;;  %v95_v18 = vsub.f32 %v71_v6, %v83_v12  ;;  %v97_v21 = vmul.f32 %v85_v13, %v85_v13  ;;  %v99_v22 = vmul.f32 %v87_v14, %v87_v14  ;;  %v70_v26 = vld [vmem:[#allocation2 + $0x48] sm:$0xff]  ;;  %v72_v30 = vld [vmem:[#allocation2 + $0x58] sm:$0xff]  ;;  %p213_p13 = por %p212_p12, %p211_p11 }
  0x23   :  { %v101_v23 = vmul.f32 %v89_v15, %v89_v15  ;;  %v103_v27 = vmul.f32 %v91_v16, %v91_v16  ;;  %v74_v31 = vld [vmem:[#allocation5 + $0x8] sm:$0xff]  ;;  %v76_v32 = vld [vmem:[#allocation5 + $0x18] sm:$0xff] }
  0x24   :  { %v105_v28 = vmul.f32 %v93_v17, %v93_v17  ;;  %v107_v29 = vmul.f32 %v95_v18, %v95_v18  ;;  %v110_v33 = vsel %vm58_vm0, %v97_v21, 0.0  ;;  %v111_v34 = vsel %vm58_vm0, %v99_v22, 0.0  ;;  %v78_v36 = vld [vmem:[#allocation5 + $0x28] sm:$0xff]  ;;  %v80_v37 = vld [vmem:[#allocation5 + $0x38] sm:$0xff]  ;;  %v136_v62 = vld [vmem:[#allocation7] sm:$0xff]  ;;  %p214_p0 = pnand %p213_p13, %p207_p10 }
  0x25   :  { %v113_v35 = vsel %vm58_vm0, %v101_v23, 0.0  ;;  %v82_v38 = vld [vmem:[#allocation5 + $0x48] sm:$0xff]  ;;  %v86_v39 = vsub.f32 %v62_v19, %v74_v31  ;;  %v112_v40 = vadd.f32 %v111_v34, %v110_v33  ;;  %v120_v41 = vsel %vm58_vm0, %v103_v27, 0.0  ;;  %v84_v44 = vld [vmem:[#allocation5 + $0x58] sm:$0xff] }
  0x26   :  { %v121_v42 = vsel %vm58_vm0, %v105_v28, 0.0  ;;  %v123_v43 = vsel %vm58_vm0, %v107_v29, 0.0  ;;  %v88_v46 = vsub.f32 %v64_v20, %v76_v32  ;;  %v90_v47 = vsub.f32 %v66_v24, %v78_v36  ;;  %v137_v12 = vld [vmem:[#allocation7 + $0x8] sm:$0xff] }
  0x27   :  { %v122_v45 = vadd.f32 %v121_v42, %v120_v41  ;;  %v92_v48 = vsub.f32 %v68_v25, %v80_v37  ;;  %v114_v49 = vadd.f32 %v113_v35, %v112_v40  ;;  %v94_v50 = vsub.f32 %v70_v26, %v82_v38 }
  0x28   :  { %v96_v51 = vsub.f32 %v72_v30, %v84_v44  ;;  %v98_v52 = vmul.f32 %v86_v39, %v86_v39  ;;  %v100_v54 = vmul.f32 %v88_v46, %v88_v46  ;;  %v102_v55 = vmul.f32 %v90_v47, %v90_v47 }
  0x29   :  { %v124_v53 = vadd.f32 %v123_v43, %v122_v45  ;;  %v104_v56 = vmul.f32 %v92_v48, %v92_v48  ;;  %v130_v57 = vsel %vm58_vm0, %v114_v49, 0.0  ;;  %v106_v58 = vmul.f32 %v94_v50, %v94_v50 }
  0x2a   :  { %v108_v59 = vmul.f32 %v96_v51, %v96_v51  ;;  %v115_v60 = vsel %vm58_vm0, %v98_v52, 0.0  ;;  %v116_v63 = vsel %vm58_vm0, %v100_v54, 0.0  ;;  %v118_v0 = vsel %vm58_vm0, %v102_v55, 0.0 }
  0x2b   :  { %v131_v61 = vsel %vm58_vm0, %v124_v53, 0.0  ;;  %v125_v1 = vsel %vm58_vm0, %v104_v56, 0.0  ;;  %v117_v3 = vadd.f32 %v116_v63, %v115_v60  ;;  %v126_v4 = vsel %vm58_vm0, %v106_v58, 0.0 }
  0x2c   :  { %v132_v2 = vadd.f32 %v131_v61, %v130_v57  ;;  %v128_v5 = vsel %vm58_vm0, %v108_v59, 0.0  ;;  %v127_v6 = vadd.f32 %v126_v4, %v125_v1 }
  0x2d   :  { %v119_v8 = vadd.f32 %v118_v0, %v117_v3 }
  0x2e   :  { %v138_v7 = vadd.f32 %v136_v62, %v132_v2  ;;  %v129_v9 = vadd.f32 %v128_v5, %v127_v6 }
  0x2f   :  { %v133_v10 = vsel %vm58_vm0, %v119_v8, 0.0 }
  0x30   :  { %140 = vst.msk [vmem:[#allocation7] sm:$0xff] %vm58_vm0, %v138_v7  ;;  %v134_v11 = vsel %vm58_vm0, %v129_v9, 0.0 }
  0x31   :  { %v135_v13 = vadd.f32 %v134_v11, %v133_v10 }
  0x33   :  { %v139_v14 = vadd.f32 %v137_v12, %v135_v13 }
  0x35   :  { %141 = vst.msk [vmem:[#allocation7 + $0x8] sm:$0xff] %vm58_vm0, %v139_v14 }
  0x36   :  { %217 = shalt.err (!%p214_p0)
}
  0x37   :  { %153 = dma.vmem_to_hbm [thread:$0]  %s148_s1, 256, %s293_s2, [#allocation4], %s233_s12, %s233_s12, %s234_s13  }
  0x38   :  { %230 = dma.done.wait [#allocation4], 256  }
  0x39   :  { %231 = vsyncadd [#allocation4], 4294967040 }
  0x3a   :  { %157 = vsyncpa [#allocation3], 1 }
  0x3b   :  { %158 = vsyncpa [#allocation6], 1 }
  0x3c   :  { %159 = vsyncpa [#allocation4], 1 }

</bundles_post_ra>
